<compile_context>
chip_gen: v7x
topology: tpu7x:2x2x1
jax: 0.10.0
libtpu: 0.0.40
codegen_flags: <defaults>
</compile_context>

<pallas_src>
import numpy as np
import jax
import jax.numpy as jnp
from jax import lax
from jax.experimental import pallas as pl
from jax.experimental.pallas import tpu as pltpu


def _elu(x):
    return jnp.where(x > 0, x, jnp.exp(x) - 1.0)


def _type_b_mask(K):
    mask = np.ones((K, K), dtype=bool)
    mask[K // 2, K // 2 + 1:] = False   # type 'B': keep the center pixel
    mask[K // 2 + 1:, :] = False
    return mask


def _weight_norm(v, g):
    # v: (out, in, kh, kw), g: (out,); norm taken per output channel (dim=0)
    norm = jnp.sqrt(jnp.sum(v * v, axis=(1, 2, 3), keepdims=True))
    return v * (g[:, None, None, None] / norm)


def _vmem_capacity_bytes():
    """Per-core VMEM capacity; conservative v7x value if the query fails."""
    try:
        return int(pltpu.get_tpu_info().vmem_capacity_bytes)
    except Exception:
        return 64 << 20


def _pick_nb(N, HW, Cin, T, vmem_budget, *, target_lanes=8192,
             min_split_lanes=1024, dtype_bytes=4):
    """Images per grid step.

    Sized so each step's VMEM footprint (x/out double-buffered, resident
    border mask, slack for f32 intermediates) stays under `vmem_budget`,
    aiming for L = Nb*HW of ~`target_lanes` lanes (per-step overhead ~0.35us
    and DMA efficiency both favour big blocks).  A batch that already fits a
    single step is only split in two (for v7x megacore) when each half stays
    >= `min_split_lanes` wide, so single-TC chips never pay for tiny steps.
    """
    Cmid = Cin // 2
    per_image = (2 * Cin + 2 * Cin + T + 6 * Cmid) * HW * dtype_bytes
    nb_vmem = max(1, vmem_budget // per_image)
    nb_lanes = max(1, -(-target_lanes // HW))            # ceil
    nb_cap = max(1, min(N, nb_vmem, nb_lanes))

    def ok(nb):
        # the lane dim of every (.., L) block must be 128-aligned unless the
        # block spans the full array (single grid step)
        return nb == N or (nb * HW) % 128 == 0

    nb = N                                               # grid=1 always valid
    for cand in range(nb_cap, 0, -1):
        if N % cand == 0 and ok(cand):
            nb = cand
            break
    if nb == N and N % 2 == 0:
        half = N // 2
        if ok(half) and half * HW >= min_split_lanes:
            nb = half                                    # give both TCs work
    return nb


def _make_kernel(W, Cmid, offsets):
    def kernel(x_ref, w1_ref, b1_ref, wm_ref, b2_ref, w3_ref, b3_ref,
               mask_ref, o_ref):
        x = x_ref[...].astype(jnp.float32)                       # (Cin, L)

        # --- 1x1 weight-normed conv + ELU: (Cmid,Cin)@(Cin,L) GEMM ---------
        h1 = jnp.dot(w1_ref[...], x,
                     preferred_element_type=jnp.float32) + b1_ref[...]
        h1 = _elu(h1)                                            # (Cmid, L)

        # --- type-'B' masked KxK conv --------------------------------------
        # Each un-masked tap (dy,dx): lane roll (XLU) of the flat
        # (image,row,col) axis by -(dy*W+dx), zeroed at image borders by the
        # VMEM-resident mask, then a tiny (Cmid,Cmid)@(Cmid,L) MXU matmul
        # accumulated in registers — no tap scratch, no unaligned sublane
        # stores, no store/reload round trip.
        acc = None
        for t, (dy, dx) in enumerate(offsets):
            off = dy * W + dx                                    # static, <= 0
            if off == 0:
                tap = h1
            else:
                # (1,L) mask row; the implicit sublane broadcast in the
                # multiply is cheap VPU filler hidden under the HBM roofline.
                tap = pltpu.roll(h1, -off, axis=1) * mask_ref[pl.ds(t, 1), :]
            part = jnp.dot(wm_ref[t], tap, preferred_element_type=jnp.float32)
            acc = part if acc is None else acc + part
        h2 = _elu(acc + b2_ref[...])                             # (Cmid, L)

        # --- final 1x1 weight-normed conv + residual + ELU ------------------
        y = jnp.dot(w3_ref[...], h2,
                    preferred_element_type=jnp.float32) + b3_ref[...]
        o_ref[...] = _elu(y + x).astype(o_ref.dtype)

    return kernel


def pixelcnn_block(x_nchw, params, kernel_size):
    N, Cin, H, W = x_nchw.shape
    K = kernel_size
    P = K // 2
    Cmid = Cin // 2
    HW = H * W

    mask_np = _type_b_mask(K)
    taps = [(ki, kj) for ki in range(K) for kj in range(K) if mask_np[ki, kj]]
    offsets = tuple((ki - P, kj - P) for ki, kj in taps)
    T = len(offsets)

    # Roll-safety invariant (see header comment).
    assert all(dy * W + dx <= 0 for dy, dx in offsets), "type-'B' invariant"
    assert all(abs(dy * W + dx) < HW for dy, dx in offsets)

    # ---- parameter glue: weight norm + per-tap weight stack (plain JAX) ----
    w1 = _weight_norm(params["v1"], params["g1"])[:, :, 0, 0]    # (Cmid, Cin)
    w3 = _weight_norm(params["v3"], params["g3"])[:, :, 0, 0]    # (Cin, Cmid)
    # Only un-masked taps are shipped: (T, Cmid_out, Cmid_in), one slab per tap.
    wm_taps = jnp.stack([params["wm"][:, :, ki, kj] for ki, kj in taps], axis=0)

    b1 = params["b1"].reshape(Cmid, 1)
    b2 = params["b2"].reshape(Cmid, 1)
    b3 = params["b3"].reshape(Cin, 1)

    # ---- block sizing against the per-core VMEM budget ---------------------
    vmem_cap = _vmem_capacity_bytes()
    vmem_budget = int(min(0.55 * vmem_cap, 72 << 20))
    Nb = _pick_nb(N, HW, Cin, T, vmem_budget)
    L = Nb * HW
    grid = (N // Nb,)

    # ---- per-tap zero-padding border mask: ONE (T, L) block with a constant
    # index_map => DMA'd from HBM once, resident in VMEM for all grid steps.
    rows = np.arange(HW, dtype=np.int64) // W
    cols = np.arange(HW, dtype=np.int64) % W
    tap_mask_np = np.zeros((T, HW), np.float32)
    for t, (dy, dx) in enumerate(offsets):
        valid = ((rows + dy >= 0) & (rows + dy < H) &
                 (cols + dx >= 0) & (cols + dx < W))
        tap_mask_np[t] = valid.astype(np.float32)
    tap_mask = jnp.asarray(np.tile(tap_mask_np, (1, Nb)))        # (T, Nb*HW)

    # channels-first flat layout: lanes carry (image, row, col) — every output
    # store is lane-dense and the 1x1 convs become channel x lane GEMMs.
    x_flat = jnp.transpose(x_nchw, (1, 0, 2, 3)).reshape(Cin, N * HW)

    # vmem limit: x/out double-buffered + resident mask + slack for f32
    # intermediates / register spill; floored at the 32 MiB default and kept
    # well under the physical per-core capacity (v7x: 64 MiB).
    est = 4 * (4 * Cin * L + T * L + 8 * Cmid * L) + (2 << 20)
    vmem_limit = int(min(vmem_cap - (8 << 20), max(32 << 20, est)))

    kernel = _make_kernel(W, Cmid, offsets)

    out_flat = pl.pallas_call(
        kernel,
        out_shape=jax.ShapeDtypeStruct((Cin, N * HW), x_nchw.dtype),
        grid_spec=pltpu.PrefetchScalarGridSpec(
            num_scalar_prefetch=0,
            grid=grid,
            in_specs=[
                pl.BlockSpec((Cin, L), lambda g: (0, g)),            # x
                pl.BlockSpec((Cmid, Cin), lambda g: (0, 0)),         # w1
                pl.BlockSpec((Cmid, 1), lambda g: (0, 0)),           # b1
                pl.BlockSpec((T, Cmid, Cmid), lambda g: (0, 0, 0)),  # tap weights
                pl.BlockSpec((Cmid, 1), lambda g: (0, 0)),           # b2
                pl.BlockSpec((Cin, Cmid), lambda g: (0, 0)),         # w3
                pl.BlockSpec((Cin, 1), lambda g: (0, 0)),            # b3
                pl.BlockSpec((T, L), lambda g: (0, 0)),              # border mask (resident)
            ],
            out_specs=pl.BlockSpec((Cin, L), lambda g: (0, g)),
        ),
        compiler_params=pltpu.CompilerParams(
            dimension_semantics=("parallel",),
            vmem_limit_bytes=vmem_limit),
    )(x_flat, w1, b1, wm_taps, b2, w3, b3, tap_mask)

    out = out_flat.reshape(Cin, N, H, W)
    return jnp.transpose(out, (1, 0, 2, 3))                       # back to NCHW


def init_params(key, in_channels, kernel_size):
    Cin = in_channels
    Cmid = Cin // 2
    K = kernel_size
    ks = jax.random.split(key, 6)
    return dict(
        v1=jax.random.normal(ks[0], (Cmid, Cin, 1, 1), jnp.float32) * 0.05,
        g1=jnp.ones((Cmid,), jnp.float32),
        b1=jax.random.normal(ks[1], (Cmid,), jnp.float32) * 0.01,
        wm=jax.random.normal(ks[2], (Cmid, Cmid, K, K), jnp.float32) * 0.05,
        b2=jax.random.normal(ks[3], (Cmid,), jnp.float32) * 0.01,
        v3=jax.random.normal(ks[4], (Cin, Cmid, 1, 1), jnp.float32) * 0.05,
        g3=jnp.ones((Cin,), jnp.float32),
        b3=jax.random.normal(ks[5], (Cin,), jnp.float32) * 0.01,
    )


def reference(x_nchw, params, kernel_size):
    """Pure-JAX NCHW reference mirroring the PyTorch module."""
    K = kernel_size
    P = K // 2
    mask = jnp.asarray(_type_b_mask(K), jnp.float32)
    dn = ("NCHW", "OIHW", "NCHW")

    def conv(x, w, b, pad):
        y = lax.conv_general_dilated(x, w, (1, 1), [(pad, pad), (pad, pad)],
                                     dimension_numbers=dn)
        return y + b[None, :, None, None]

    w1 = _weight_norm(params["v1"], params["g1"])
    w3 = _weight_norm(params["v3"], params["g3"])
    wm = params["wm"] * mask[None, None, :, :]

    h = _elu(conv(x_nchw, w1, params["b1"], 0))
    h = _elu(conv(h, wm, params["b2"], P))
    h = conv(h, w3, params["b3"], 0)
    return _elu(h + x_nchw)


if __name__ == "__main__":
    N, Cin, H, W = 2, 8, 16, 16
    kernel_size = 3

    key = jax.random.PRNGKey(0)
    kx, kp = jax.random.split(key)
    x = jax.random.normal(kx, (N, Cin, H, W), jnp.float32)
    params = init_params(kp, Cin, kernel_size)

    out = jax.block_until_ready(pixelcnn_block(x, params, kernel_size))
    ref = jax.block_until_ready(reference(x, params, kernel_size))

    np.testing.assert_allclose(np.asarray(out), np.asarray(ref),
                               rtol=1e-4, atol=1e-4)
    print("KERNEL_OK")
</pallas_src>

<mosaic_0001>
module attributes {stable_mosaic.version = 11 : i64} {
  func.func @kernel(%arg0: i32, %arg1: memref<8x512xf32, #tpu.memory_space<vmem>>, %arg2: memref<4x8xf32, #tpu.memory_space<vmem>>, %arg3: memref<4x1xf32, #tpu.memory_space<vmem>>, %arg4: memref<5x4x4xf32, #tpu.memory_space<vmem>>, %arg5: memref<4x1xf32, #tpu.memory_space<vmem>>, %arg6: memref<8x4xf32, #tpu.memory_space<vmem>>, %arg7: memref<8x1xf32, #tpu.memory_space<vmem>>, %arg8: memref<5x512xf32, #tpu.memory_space<vmem>>, %arg9: memref<8x512xf32, #tpu.memory_space<vmem>>) attributes {dimension_semantics = [#tpu.dimension_semantics<parallel>], iteration_bounds = array<i64: 1>, scalar_prefetch = 0 : i64, scratch_operands = 0 : i64, tpu.core_type = #tpu.core_type<tc>, window_params = [{transform_indices = @transform_0, window_bounds = array<i64: 8, 512>}, {pipeline_mode = #tpu.pipeline_mode<synchronous>, transform_indices = @transform_1, window_bounds = array<i64: 4, 8>}, {pipeline_mode = #tpu.pipeline_mode<synchronous>, transform_indices = @transform_2, window_bounds = array<i64: 4, 1>}, {pipeline_mode = #tpu.pipeline_mode<synchronous>, transform_indices = @transform_3, window_bounds = array<i64: 5, 4, 4>}, {pipeline_mode = #tpu.pipeline_mode<synchronous>, transform_indices = @transform_4, window_bounds = array<i64: 4, 1>}, {pipeline_mode = #tpu.pipeline_mode<synchronous>, transform_indices = @transform_5, window_bounds = array<i64: 8, 4>}, {pipeline_mode = #tpu.pipeline_mode<synchronous>, transform_indices = @transform_6, window_bounds = array<i64: 8, 1>}, {pipeline_mode = #tpu.pipeline_mode<synchronous>, transform_indices = @transform_7, window_bounds = array<i64: 5, 512>}, {transform_indices = @transform_8, window_bounds = array<i64: 8, 512>}]} {
    %c0 = arith.constant 0 : index
    %c0_0 = arith.constant 0 : index
    %0 = vector.load %arg1[%c0, %c0_0] : memref<8x512xf32, #tpu.memory_space<vmem>>, vector<8x512xf32>
    %c0_1 = arith.constant 0 : index
    %c0_2 = arith.constant 0 : index
    %1 = vector.load %arg2[%c0_1, %c0_2] : memref<4x8xf32, #tpu.memory_space<vmem>>, vector<4x8xf32>
    %cst = arith.constant dense<0.000000e+00> : vector<4x512xf32>
    %2 = tpu.matmul %1, %0, %cst {dimension_numbers = #tpu.dot_dimension_numbers<[1], [0], [0], [1], [0, 0, 1, 1], [], []>} : vector<4x8xf32>, vector<8x512xf32>, vector<4x512xf32> -> vector<4x512xf32>
    %c0_3 = arith.constant 0 : index
    %c0_4 = arith.constant 0 : index
    %3 = vector.load %arg3[%c0_3, %c0_4] : memref<4x1xf32, #tpu.memory_space<vmem>>, vector<4x1xf32>
    %4 = vector.broadcast %3 : vector<4x1xf32> to vector<4x512xf32>
    %5 = arith.addf %2, %4 : vector<4x512xf32>
    %cst_5 = arith.constant 0.000000e+00 : f32
    %6 = vector.broadcast %cst_5 : f32 to vector<4x512xf32>
    %7 = arith.cmpf ogt, %5, %6 : vector<4x512xf32>
    %8 = math.exp %5 : vector<4x512xf32>
    %cst_6 = arith.constant 1.000000e+00 : f32
    %9 = vector.broadcast %cst_6 : f32 to vector<4x512xf32>
    %10 = arith.subf %8, %9 : vector<4x512xf32>
    %11 = arith.select %7, %5, %10 : vector<4x512xi1>, vector<4x512xf32>
    %c17_i32 = arith.constant 17 : i32
    %12 = tpu.dynamic_rotate %11 by %c17_i32 dim 1 : vector<4x512xf32>, i32 -> vector<4x512xf32>
    %c0_7 = arith.constant 0 : index
    %c0_8 = arith.constant 0 : index
    %13 = vector.load %arg8[%c0_7, %c0_8] : memref<5x512xf32, #tpu.memory_space<vmem>>, vector<1x512xf32>
    %14 = vector.broadcast %13 : vector<1x512xf32> to vector<4x512xf32>
    %15 = arith.mulf %12, %14 : vector<4x512xf32>
    %c0_9 = arith.constant 0 : index
    %c0_10 = arith.constant 0 : index
    %c0_11 = arith.constant 0 : index
    %16 = vector.load %arg4[%c0_9, %c0_10, %c0_11] : memref<5x4x4xf32, #tpu.memory_space<vmem>>, vector<1x4x4xf32>
    %17 = vector.shape_cast %16 : vector<1x4x4xf32> to vector<4x4xf32>
    %cst_12 = arith.constant dense<0.000000e+00> : vector<4x512xf32>
    %18 = tpu.matmul %17, %15, %cst_12 {dimension_numbers = #tpu.dot_dimension_numbers<[1], [0], [0], [1], [0, 0, 1, 1], [], []>} : vector<4x4xf32>, vector<4x512xf32>, vector<4x512xf32> -> vector<4x512xf32>
    %c16_i32 = arith.constant 16 : i32
    %19 = tpu.dynamic_rotate %11 by %c16_i32 dim 1 : vector<4x512xf32>, i32 -> vector<4x512xf32>
    %c1 = arith.constant 1 : index
    %c0_13 = arith.constant 0 : index
    %20 = vector.load %arg8[%c1, %c0_13] : memref<5x512xf32, #tpu.memory_space<vmem>>, vector<1x512xf32>
    %21 = vector.broadcast %20 : vector<1x512xf32> to vector<4x512xf32>
    %22 = arith.mulf %19, %21 : vector<4x512xf32>
    %c1_14 = arith.constant 1 : index
    %c0_15 = arith.constant 0 : index
    %c0_16 = arith.constant 0 : index
    %23 = vector.load %arg4[%c1_14, %c0_15, %c0_16] : memref<5x4x4xf32, #tpu.memory_space<vmem>>, vector<1x4x4xf32>
    %24 = vector.shape_cast %23 : vector<1x4x4xf32> to vector<4x4xf32>
    %cst_17 = arith.constant dense<0.000000e+00> : vector<4x512xf32>
    %25 = tpu.matmul %24, %22, %cst_17 {dimension_numbers = #tpu.dot_dimension_numbers<[1], [0], [0], [1], [0, 0, 1, 1], [], []>} : vector<4x4xf32>, vector<4x512xf32>, vector<4x512xf32> -> vector<4x512xf32>
    %26 = arith.addf %18, %25 : vector<4x512xf32>
    %c15_i32 = arith.constant 15 : i32
    %27 = tpu.dynamic_rotate %11 by %c15_i32 dim 1 : vector<4x512xf32>, i32 -> vector<4x512xf32>
    %c2 = arith.constant 2 : index
    %c0_18 = arith.constant 0 : index
    %28 = vector.load %arg8[%c2, %c0_18] : memref<5x512xf32, #tpu.memory_space<vmem>>, vector<1x512xf32>
    %29 = vector.broadcast %28 : vector<1x512xf32> to vector<4x512xf32>
    %30 = arith.mulf %27, %29 : vector<4x512xf32>
    %c2_19 = arith.constant 2 : index
    %c0_20 = arith.constant 0 : index
    %c0_21 = arith.constant 0 : index
    %31 = vector.load %arg4[%c2_19, %c0_20, %c0_21] : memref<5x4x4xf32, #tpu.memory_space<vmem>>, vector<1x4x4xf32>
    %32 = vector.shape_cast %31 : vector<1x4x4xf32> to vector<4x4xf32>
    %cst_22 = arith.constant dense<0.000000e+00> : vector<4x512xf32>
    %33 = tpu.matmul %32, %30, %cst_22 {dimension_numbers = #tpu.dot_dimension_numbers<[1], [0], [0], [1], [0, 0, 1, 1], [], []>} : vector<4x4xf32>, vector<4x512xf32>, vector<4x512xf32> -> vector<4x512xf32>
    %34 = arith.addf %26, %33 : vector<4x512xf32>
    %c1_i32 = arith.constant 1 : i32
    %35 = tpu.dynamic_rotate %11 by %c1_i32 dim 1 : vector<4x512xf32>, i32 -> vector<4x512xf32>
    %c3 = arith.constant 3 : index
    %c0_23 = arith.constant 0 : index
    %36 = vector.load %arg8[%c3, %c0_23] : memref<5x512xf32, #tpu.memory_space<vmem>>, vector<1x512xf32>
    %37 = vector.broadcast %36 : vector<1x512xf32> to vector<4x512xf32>
    %38 = arith.mulf %35, %37 : vector<4x512xf32>
    %c3_24 = arith.constant 3 : index
    %c0_25 = arith.constant 0 : index
    %c0_26 = arith.constant 0 : index
    %39 = vector.load %arg4[%c3_24, %c0_25, %c0_26] : memref<5x4x4xf32, #tpu.memory_space<vmem>>, vector<1x4x4xf32>
    %40 = vector.shape_cast %39 : vector<1x4x4xf32> to vector<4x4xf32>
    %cst_27 = arith.constant dense<0.000000e+00> : vector<4x512xf32>
    %41 = tpu.matmul %40, %38, %cst_27 {dimension_numbers = #tpu.dot_dimension_numbers<[1], [0], [0], [1], [0, 0, 1, 1], [], []>} : vector<4x4xf32>, vector<4x512xf32>, vector<4x512xf32> -> vector<4x512xf32>
    %42 = arith.addf %34, %41 : vector<4x512xf32>
    %c4 = arith.constant 4 : index
    %c0_28 = arith.constant 0 : index
    %c0_29 = arith.constant 0 : index
    %43 = vector.load %arg4[%c4, %c0_28, %c0_29] : memref<5x4x4xf32, #tpu.memory_space<vmem>>, vector<1x4x4xf32>
    %44 = vector.shape_cast %43 : vector<1x4x4xf32> to vector<4x4xf32>
    %cst_30 = arith.constant dense<0.000000e+00> : vector<4x512xf32>
    %45 = tpu.matmul %44, %11, %cst_30 {dimension_numbers = #tpu.dot_dimension_numbers<[1], [0], [0], [1], [0, 0, 1, 1], [], []>} : vector<4x4xf32>, vector<4x512xf32>, vector<4x512xf32> -> vector<4x512xf32>
    %46 = arith.addf %42, %45 : vector<4x512xf32>
    %c0_31 = arith.constant 0 : index
    %c0_32 = arith.constant 0 : index
    %47 = vector.load %arg5[%c0_31, %c0_32] : memref<4x1xf32, #tpu.memory_space<vmem>>, vector<4x1xf32>
    %48 = vector.broadcast %47 : vector<4x1xf32> to vector<4x512xf32>
    %49 = arith.addf %46, %48 : vector<4x512xf32>
    %cst_33 = arith.constant 0.000000e+00 : f32
    %50 = vector.broadcast %cst_33 : f32 to vector<4x512xf32>
    %51 = arith.cmpf ogt, %49, %50 : vector<4x512xf32>
    %52 = math.exp %49 : vector<4x512xf32>
    %cst_34 = arith.constant 1.000000e+00 : f32
    %53 = vector.broadcast %cst_34 : f32 to vector<4x512xf32>
    %54 = arith.subf %52, %53 : vector<4x512xf32>
    %55 = arith.select %51, %49, %54 : vector<4x512xi1>, vector<4x512xf32>
    %c0_35 = arith.constant 0 : index
    %c0_36 = arith.constant 0 : index
    %56 = vector.load %arg6[%c0_35, %c0_36] : memref<8x4xf32, #tpu.memory_space<vmem>>, vector<8x4xf32>
    %cst_37 = arith.constant dense<0.000000e+00> : vector<8x512xf32>
    %57 = tpu.matmul %56, %55, %cst_37 {dimension_numbers = #tpu.dot_dimension_numbers<[1], [0], [0], [1], [0, 0, 1, 1], [], []>} : vector<8x4xf32>, vector<4x512xf32>, vector<8x512xf32> -> vector<8x512xf32>
    %c0_38 = arith.constant 0 : index
    %c0_39 = arith.constant 0 : index
    %58 = vector.load %arg7[%c0_38, %c0_39] : memref<8x1xf32, #tpu.memory_space<vmem>>, vector<8x1xf32>
    %59 = vector.broadcast %58 : vector<8x1xf32> to vector<8x512xf32>
    %60 = arith.addf %57, %59 : vector<8x512xf32>
    %61 = arith.addf %60, %0 : vector<8x512xf32>
    %cst_40 = arith.constant 0.000000e+00 : f32
    %62 = vector.broadcast %cst_40 : f32 to vector<8x512xf32>
    %63 = arith.cmpf ogt, %61, %62 : vector<8x512xf32>
    %64 = math.exp %61 : vector<8x512xf32>
    %cst_41 = arith.constant 1.000000e+00 : f32
    %65 = vector.broadcast %cst_41 : f32 to vector<8x512xf32>
    %66 = arith.subf %64, %65 : vector<8x512xf32>
    %67 = arith.select %63, %61, %66 : vector<8x512xi1>, vector<8x512xf32>
    %c0_42 = arith.constant 0 : index
    %c0_43 = arith.constant 0 : index
    %68 = vector.load %arg9[%c0_42, %c0_43] : memref<8x512xf32, #tpu.memory_space<vmem>>, vector<8x512xf32>
    tpu.vector_store %arg9[%c0_42, %c0_43], %67 {strides = array<i32>} : memref<8x512xf32, #tpu.memory_space<vmem>>, vector<8x512xf32>,
    return
  }
  func.func @transform_0(%arg0: i32) -> (i32, i32) {
    %c0_i32 = arith.constant 0 : i32
    %c0_i32_0 = arith.constant 0 : i32
    return %c0_i32, %arg0 : i32, i32
  }
  func.func @transform_1(%arg0: i32) -> (i32, i32) {
    %c0_i32 = arith.constant 0 : i32
    %c0_i32_0 = arith.constant 0 : i32
    %c0_i32_1 = arith.constant 0 : i32
    return %c0_i32, %c0_i32_0 : i32, i32
  }
  func.func @transform_2(%arg0: i32) -> (i32, i32) {
    %c0_i32 = arith.constant 0 : i32
    %c0_i32_0 = arith.constant 0 : i32
    %c0_i32_1 = arith.constant 0 : i32
    return %c0_i32, %c0_i32_0 : i32, i32
  }
  func.func @transform_3(%arg0: i32) -> (i32, i32, i32) {
    %c0_i32 = arith.constant 0 : i32
    %c0_i32_0 = arith.constant 0 : i32
    %c0_i32_1 = arith.constant 0 : i32
    %c0_i32_2 = arith.constant 0 : i32
    return %c0_i32, %c0_i32_0, %c0_i32_1 : i32, i32, i32
  }
  func.func @transform_4(%arg0: i32) -> (i32, i32) {
    %c0_i32 = arith.constant 0 : i32
    %c0_i32_0 = arith.constant 0 : i32
    %c0_i32_1 = arith.constant 0 : i32
    return %c0_i32, %c0_i32_0 : i32, i32
  }
  func.func @transform_5(%arg0: i32) -> (i32, i32) {
    %c0_i32 = arith.constant 0 : i32
    %c0_i32_0 = arith.constant 0 : i32
    %c0_i32_1 = arith.constant 0 : i32
    return %c0_i32, %c0_i32_0 : i32, i32
  }
  func.func @transform_6(%arg0: i32) -> (i32, i32) {
    %c0_i32 = arith.constant 0 : i32
    %c0_i32_0 = arith.constant 0 : i32
    %c0_i32_1 = arith.constant 0 : i32
    return %c0_i32, %c0_i32_0 : i32, i32
  }
  func.func @transform_7(%arg0: i32) -> (i32, i32) {
    %c0_i32 = arith.constant 0 : i32
    %c0_i32_0 = arith.constant 0 : i32
    %c0_i32_1 = arith.constant 0 : i32
    return %c0_i32, %c0_i32_0 : i32, i32
  }
  func.func @transform_8(%arg0: i32) -> (i32, i32) {
    %c0_i32 = arith.constant 0 : i32
    %c0_i32_0 = arith.constant 0 : i32
    return %c0_i32, %arg0 : i32, i32
  }
}

</mosaic_0001>

<bundles_post_ra>
// kernel: tpu_custom_call.1
= control target key start
LH: loop header
LB: loop body
LE: loop exit
PB: predicated region body
PF: predicated region fallthrough
CT: control target
= control target key end

     0   :  { %13 = vsyncpa [#allocation3], 0  ;;  %s1856_s0 = inlined_call_operand.vmem [shape: f32[8,512], index: 0, kind: input, shape index: {}]   ;;  %s1857_s1 = inlined_call_operand.hbm [shape: f32[4,8], index: 1, kind: input, shape index: {}]   ;;  %s1858_s2 = inlined_call_operand.vmem [shape: f32[4,1], index: 2, kind: input, shape index: {}]   ;;  %s1859_s3 = inlined_call_operand.vmem [shape: f32[5,4,4], index: 3, kind: input, shape index: {}]   ;;  %s1860_s4 = inlined_call_operand.vmem [shape: f32[4,1], index: 4, kind: input, shape index: {}]   ;;  %s1861_s5 = inlined_call_operand.vmem [shape: f32[8,4], index: 5, kind: input, shape index: {}]   ;;  %s1862_s6 = inlined_call_operand.vmem [shape: f32[8,1], index: 6, kind: input, shape index: {}]   ;;  %s1863_s7 = inlined_call_operand.vmem [shape: f32[5,512], index: 7, kind: input, shape index: {}]   ;;  %s1864_s8 = inlined_call_operand.hbm [shape: f32[8,512], index: 8, kind: output, shape index: {}]  }
   0x1   :  { %14 = vsyncpa [#allocation4], 0  ;;  %s1580_s27 = smov [#allocation2]   ;;  %s1532_s9 = scalar_lea.hbm %s1857_s1, 64 }
   0x2   :  { %s23_s28 = sshll.u32 %s1580_s27, 4  ;;  %p1533_p0 = scmp.ne.s32.totalorder %s1857_s1, %s1532_s9  ;;  %s24_s28 = int_to_ptr.vmem [resolvable:$true] %s23_s28 }
   0x3   :  { %p1536_p1 = scmp.lt.u32.totalorder %s1532_s9, %s1857_s1 }
   0x5   :  { %p1538_p2 = pnand %p1536_p1, %p1533_p0 }
   0x7   :  { %1541 = shalt.err (!%p1538_p2)
}
   0x8   :  { %s1542_s14 = scalar_lea.vmem %s24_s28, 64  ;;  %p1547_p4 = scmp.lt.s32.totalorder %s24_s28, %s24_s28 }
   0x9   :  { %p1543_p3 = scmp.ne.s32.totalorder %s24_s28, %s1542_s14  ;;  %p1548_p5 = scmp.lt.s32.totalorder %s1542_s14, %s1542_s14 }
   0xb   :  { %p1549_p6 = por %p1548_p5, %p1547_p4 }
   0xd   :  { %p1550_p7 = pnand %p1549_p6, %p1543_p3 }
   0xf   :  { %1553 = shalt.err (!%p1550_p7)
}
  0x10   :  { %26 = dma.hbm_to_vmem [thread:$0]  %s1857_s1, 64, %s24_s28, [#allocation3]  }
  0x11   :  { %1576 = dma.done.wait [#allocation3], 64  }
  0x12   :  { %1577 = vsyncadd [#allocation3], 4294967232  ;;  %v1581_v0 = vmov 0.0   ;;  %v1582_v1 = vmov 0   ;;  %v1650_v2 = vld [vmem:[%s1856_s0 + $0x8] sm:$0xff]  ;;  %v1655_v3 = vld [vmem:[%s1856_s0 + $0x18] sm:$0xff]  ;;  %v227_v35 = vlaneseq }
  0x13   :  { %121 = vmatprep.mubr.f32.mxu0 %v1581_v0  ;;  %192 = vmatprep.mubr.f32.mxu1 %v1581_v0  ;;  %v1660_v4 = vld [vmem:[%s1856_s0] sm:$0xff]  ;;  %vm53_vm0 = vcmask 64512   ;;  %v1667_v5 = vld [vmem:[%s1856_s0 + $0x10] sm:$0xff]  ;;  %s1583_s0 = smov 16   ;;  %s1585_s26 = smov 15   ;;  %vm307_vm6 = vcmask 1043456  }
  0x14   :  { %1506 = vset.pattern.permute.xlu0 %v1582_v1  ;;  %1507 = vset.pattern.permute.xlu1 %v1582_v1  ;;  %v46_v6 = vld [vmem:[#allocation2] sm:$0xf]  ;;  %s1586_s27 = smov 1   ;;  %v237_v36 = vshrl.u32 %v227_v35, 7  ;;  %v1706_v37 = vand.u32 127, %v227_v35  ;;  %vm303_vm8 = vcmask 31744  }
  0x15   :  { %57 = vmatprep.subr.mxu0 %v1650_v2  ;;  %128 = vmatprep.subr.mxu1 %v1655_v3  ;;  %v47_v7 = vld [vmem:[%s1858_s2] sm:$0xf]  ;;  %s1584_s2 = smov 17   ;;  %v1432_v61 = vld [vmem:[%s1859_s3 + $0x4] sm:$0xf] }
  0x16   :  { %58 = vmatpush1.msra.mxu0 %v1660_v4  ;;  %129 = vmatpush1.msra.mxu1 %v1667_v5  ;;  %v1219_v33 = vld [vmem:[%s1862_s6] sm:$0xff]  ;;  %v1708_v38 = vsub.s32 0, %v237_v36  ;;  %v1710_v39 = vsub.s32 3, %v237_v36  ;;  %v1712_v40 = vsub.s32 1, %v237_v36  ;;  %v1714_v41 = vsub.s32 2, %v237_v36 }
  0x17   :  { %1425 = vmatmul.mubr.msk.f32.vlgmr.msra.gmra.mrb[0].mxu0 %vm53_vm0, %v46_v6  ;;  %1426 = vmatmul.mubr.msk.f32.vlgmr.msra.gmra.mrb[0].mxu1 %vm53_vm0, %v46_v6  ;;  %v1188_v34 = vld [vmem:[%s1860_s4] sm:$0xf]  ;;  %vm269_vm5 = vcmp.lt.s32.totalorder %v1706_v37, 16  ;;  %vm229_vm7 = vcmp.lt.s32.totalorder %v1706_v37, 17  ;;  %vm627_vm9 = vcmp.lt.s32.totalorder %v1706_v37, 15  ;;  %vm830_vm10 = vcmp.lt.s32.totalorder %v1706_v37, 1 }
  0x18   :  { %50 = vperm.xlu0 %1506, %v47_v7   ;;  %384 = vmatprep.mubr.f32.mxu0 %v1581_v0  ;;  %v1431_v42 = vld [vmem:[%s1863_s7 + $0x1] ss:$8 sm:$0xf]  ;;  %v234_v50 = vld [vmem:[%s1863_s7] ss:$8 sm:$0xf] }
  0x19   :  { %455 = vmatprep.mubr.f32.mxu1 %v1581_v0  ;;  %v280_v45 = vrot.slane %v1431_v42, %v1708_v38  ;;  %v292_v46 = vrot.slane %v1431_v42, %v1710_v39  ;;  %v284_v47 = vrot.slane %v1431_v42, %v1712_v40  ;;  %v288_v48 = vrot.slane %v1431_v42, %v1714_v41 }
  0x1a   :  { %v243_v60 = vrot.slane %v234_v50, %v1712_v40  ;;  %v239_v6 = vrot.slane %v234_v50, %v1708_v38 }
  0x97   :  { %v51_v8 = vpop.permute.xlu0 %50 }
  0xea   :  { %v123_v9 = vpop.f32.mrb[0].mxu0  ;;  %v194_v10 = vpop.f32.mrb[0].mxu1 }
  0xeb   :  { %v124_v11 = vadd.f32 %v123_v9, %v51_v8  ;;  %v195_v12 = vadd.f32 %v194_v10, %v51_v8  ;;  %v125_v13 = vpop.f32.mrb[1].mxu0  ;;  %v196_v14 = vpop.f32.mrb[1].mxu1  ;;  %v251_v9 = vrot.slane %v234_v50, %v1710_v39 }
  0xec   :  { %v126_v15 = vadd.f32 %v125_v13, %v51_v8  ;;  %v197_v16 = vadd.f32 %v196_v14, %v51_v8  ;;  %v247_v8 = vrot.slane %v234_v50, %v1714_v41 }
  0xed   :  { %v203_v17 = vmul.f32 1.442695, %v124_v11  ;;  %v207_v18 = vmul.f32 1.442695, %v195_v12  ;;  %vm199_vm1 = vcmp.gt.f32.partialorder %v124_v11, 0.0  ;;  %vm201_vm2 = vcmp.gt.f32.partialorder %v195_v12, 0.0 }
  0xee   :  { %v205_v19 = vmul.f32 1.442695, %v126_v15  ;;  %v209_v20 = vmul.f32 1.442695, %v197_v16  ;;  %vm202_vm3 = vcmp.gt.f32.partialorder %v197_v16, 0.0  ;;  %vm200_vm4 = vcmp.gt.f32.partialorder %v126_v15, 0.0 }
  0xef   :  { %1508 = vpow2.f32 %v203_v17 }
  0xf0   :  { %1510 = vpow2.f32 %v207_v18 }
  0xf1   :  { %1512 = vpow2.f32 %v205_v19 }
  0xf2   :  { %1514 = vpow2.f32 %v209_v20 }
  0xf9   :  { %v1509_v21 = vpop.eup %1508 }
  0xfa   :  { %v1511_v22 = vpop.eup %1510  ;;  %v1427_v23 = vadd.f32 -1.0, %v1509_v21  ;;  %v260_v21 = vld [vmem:[%s1859_s3] sm:$0xf] }
  0xfb   :  { %v1513_v24 = vpop.eup %1512  ;;  %v1429_v25 = vadd.f32 -1.0, %v1511_v22 }
  0xfc   :  { %v1515_v26 = vpop.eup %1514  ;;  %v1676_v27 = vsel %vm199_vm1, %v124_v11, %v1427_v23  ;;  %v1428_v29 = vadd.f32 -1.0, %v1513_v24  ;;  %v1445_v11 = vld [vmem:[%s1863_s7 + $0x2] ss:$8 sm:$0xf] }
  0xfd   :  { %v1678_v28 = vsel %vm201_vm2, %v195_v12, %v1429_v25  ;;  %v1430_v30 = vadd.f32 -1.0, %v1515_v26  ;;  %261 = vrot.lane.b32.xlu0 %v1676_v27, %s1583_s0  ;;  %v642_v19 = vrot.slane %v1445_v11, %v1712_v40  ;;  %v638_v24 = vrot.slane %v1445_v11, %v1708_v38 }
  0xfe   :  { %265 = vrot.lane.b32.xlu1 %v1678_v28, %s1583_s0  ;;  %v1684_v32 = vsel %vm200_vm4, %v126_v15, %v1428_v29  ;;  %v646_v26 = vrot.slane %v1445_v11, %v1714_v41  ;;  %v650_v29 = vrot.slane %v1445_v11, %v1710_v39 }
  0xff   :  { %v1682_v31 = vsel %vm202_vm3, %v197_v16, %v1430_v30 }
 0x101   :  { %267 = vrot.lane.b32.xlu0 %v1682_v31, %s1583_s0 }
 0x102   :  { %263 = vrot.lane.b32.xlu1 %v1684_v32, %s1583_s0 }
 0x105   :  { %221 = vrot.lane.b32.xlu0 %v1684_v32, %s1584_s2 }
 0x106   :  { %219 = vrot.lane.b32.xlu1 %v1676_v27, %s1584_s2 }
 0x109   :  { %225 = vrot.lane.b32.xlu0 %v1682_v31, %s1584_s2 }
 0x10a   :  { %223 = vrot.lane.b32.xlu1 %v1678_v28, %s1584_s2 }
 0x10d   :  { %621 = vrot.lane.b32.xlu0 %v1684_v32, %s1585_s26 }
 0x10e   :  { %619 = vrot.lane.b32.xlu1 %v1676_v27, %s1585_s26 }
 0x111   :  { %625 = vrot.lane.b32.xlu0 %v1682_v31, %s1585_s26 }
 0x112   :  { %623 = vrot.lane.b32.xlu1 %v1678_v28, %s1585_s26 }
 0x115   :  { %824 = vrot.lane.b32.xlu0 %v1684_v32, %s1586_s27 }
 0x116   :  { %822 = vrot.lane.b32.xlu1 %v1676_v27, %s1586_s27 }
 0x119   :  { %828 = vrot.lane.b32.xlu0 %v1682_v31, %s1586_s27 }
 0x11a   :  { %826 = vrot.lane.b32.xlu1 %v1678_v28, %s1586_s27 }
 0x11d   :  { %1222 = vperm.xlu0 %1506, %v1219_v33   ;;  %v1453_v33 = vld [vmem:[%s1863_s7 + $0x3] ss:$8 sm:$0xf] }
 0x11e   :  { %1191 = vperm.xlu1 %1507, %v1188_v34  }
 0x16f   :  { %v262_v43 = vpop.permute.xlu0 %261 }
 0x170   :  { %v266_v44 = vpop.permute.xlu1 %265 }
 0x173   :  { %v268_v49 = vpop.permute.xlu0 %267 }
 0x174   :  { %v264_v51 = vpop.permute.xlu1 %263  ;;  %v270_v52 = vsel %vm269_vm5, %v266_v44, %v268_v49  ;;  %v273_v53 = vsel %vm269_vm5, %v268_v49, %v262_v43 }
 0x175   :  { %v271_v54 = vsel %vm269_vm5, %v264_v51, %v266_v44  ;;  %v272_v55 = vsel %vm269_vm5, %v262_v43, %v264_v51  ;;  %v297_v56 = vmul.f32 %v280_v45, %v273_v53  ;;  %v300_v57 = vmul.f32 %v292_v46, %v270_v52 }
 0x176   :  { %v298_v58 = vmul.f32 %v284_v47, %v272_v55  ;;  %v299_v59 = vmul.f32 %v288_v48, %v271_v54  ;;  %v845_v46 = vrot.slane %v1453_v33, %v1712_v40  ;;  %v1446_v48 = vld [vmem:[%s1859_s3 + $0x8] sm:$0xf]  ;;  %v841_v51 = vrot.slane %v1453_v33, %v1708_v38 }
 0x177   :  { %1436 = vmatprep.subr.msk.mxu1 %vm307_vm6, %v300_v57  ;;  %v222_v62 = vpop.permute.xlu0 %221  ;;  %v849_v40 = vrot.slane %v1453_v33, %v1714_v41  ;;  %v853_v53 = vrot.slane %v1453_v33, %v1710_v39 }
 0x178   :  { %v220_v63 = vpop.permute.xlu1 %219  ;;  %1433 = vmatprep.subr.msk.mxu0 %vm307_vm6, %v298_v58  ;;  %1437 = vmatpush1.msk.msra.mxu1 %vm307_vm6, %v299_v59  ;;  %v1454_v59 = vld [vmem:[%s1859_s3 + $0xc] sm:$0xf] }
 0x179   :  { %v232_v1 = vsel %vm229_vm7, %v220_v63, %v222_v62  ;;  %1434 = vmatpush1.msk.msra.mxu0 %vm307_vm6, %v297_v56  ;;  %1438 = vmatmul.mubr.msk.f32.vlgmr.msra.gmra.mrb[2].mxu1 %vm303_vm8, %v1432_v61 }
 0x17a   :  { %v257_v7 = vmul.f32 %v243_v60, %v232_v1  ;;  %1435 = vmatmul.mubr.msk.f32.vlgmr.msra.gmra.mrb[2].mxu0 %vm303_vm8, %v1432_v61  ;;  %612 = vmatprep.mubr.f32.mxu1 %v1581_v0 }
 0x17b   :  { %v226_v10 = vpop.permute.xlu0 %225  ;;  %541 = vmatprep.mubr.f32.mxu0 %v1581_v0 }
 0x17c   :  { %v224_v12 = vpop.permute.xlu1 %223  ;;  %1439 = vmatprep.subr.msk.mxu0 %vm307_vm6, %v257_v7  ;;  %v233_v13 = vsel %vm229_vm7, %v226_v10, %v220_v63 }
 0x17d   :  { %v231_v14 = vsel %vm229_vm7, %v222_v62, %v224_v12  ;;  %v230_v15 = vsel %vm229_vm7, %v224_v12, %v226_v10  ;;  %v256_v16 = vmul.f32 %v239_v6, %v233_v13 }
 0x17e   :  { %v258_v17 = vmul.f32 %v247_v8, %v231_v14  ;;  %v259_v18 = vmul.f32 %v251_v9, %v230_v15 }
 0x17f   :  { %1440 = vmatpush1.msk.msra.mxu0 %vm307_vm6, %v256_v16  ;;  %v622_v20 = vpop.permute.xlu0 %621 }
 0x180   :  { %v620_v22 = vpop.permute.xlu1 %619  ;;  %1442 = vmatprep.subr.msk.mxu1 %vm307_vm6, %v259_v18  ;;  %v1218_v18 = vld [vmem:[%s1861_s5] sm:$0xff]  ;;  %s1587_s5 = smov [#allocation5]  }
 0x181   :  { %v630_v23 = vsel %vm627_vm9, %v620_v22, %v622_v20  ;;  %1443 = vmatpush1.msk.msra.mxu1 %vm307_vm6, %v258_v17  ;;  %s1416_s25 = sshll.u32 %s1587_s5, 4  ;;  %s1417_s25 = int_to_ptr.vmem [resolvable:$true] %s1416_s25 }
 0x182   :  { %v656_v25 = vmul.f32 %v642_v19, %v630_v23  ;;  %1441 = vmatmul.mubr.msk.f32.vlgmr.msra.gmra.mrb[2].mxu0 %vm303_vm8, %v260_v21  ;;  %1444 = vmatmul.mubr.msk.f32.vlgmr.msra.gmra.mrb[2].mxu1 %vm303_vm8, %v260_v21  ;;  %s1554_s0 = scalar_lea.vmem %s1417_s25, 512  ;;  %p1559_p9 = scmp.lt.s32.totalorder %s1417_s25, %s1417_s25 }
 0x183   :  { %v626_v30 = vpop.permute.xlu0 %625  ;;  %740 = vmatprep.mubr.f32.mxu0 %v1581_v0  ;;  %811 = vmatprep.mubr.f32.mxu1 %v1581_v0  ;;  %p1555_p8 = scmp.ne.s32.totalorder %s1417_s25, %s1554_s0  ;;  %p1560_p10 = scmp.lt.s32.totalorder %s1554_s0, %s1554_s0 }
 0x184   :  { %v624_v34 = vpop.permute.xlu1 %623  ;;  %1447 = vmatprep.subr.msk.mxu0 %vm307_vm6, %v656_v25  ;;  %v631_v35 = vsel %vm627_vm9, %v626_v30, %v620_v22 }
 0x185   :  { %v629_v36 = vsel %vm627_vm9, %v622_v20, %v624_v34  ;;  %v628_v42 = vsel %vm627_vm9, %v624_v34, %v626_v30  ;;  %v655_v43 = vmul.f32 %v638_v24, %v631_v35  ;;  %p1561_p11 = por %p1560_p10, %p1559_p9 }
 0x186   :  { %v657_v44 = vmul.f32 %v646_v26, %v629_v36  ;;  %v658_v45 = vmul.f32 %v650_v29, %v628_v42 }
 0x187   :  { %1448 = vmatpush1.msk.msra.mxu0 %vm307_vm6, %v655_v43  ;;  %v825_v47 = vpop.permute.xlu0 %824  ;;  %p1562_p12 = pnand %p1561_p11, %p1555_p8 }
 0x188   :  { %v823_v49 = vpop.permute.xlu1 %822  ;;  %1450 = vmatprep.subr.msk.mxu1 %vm307_vm6, %v658_v45 }
 0x189   :  { %v833_v50 = vsel %vm830_vm10, %v823_v49, %v825_v47  ;;  %1451 = vmatpush1.msk.msra.mxu1 %vm307_vm6, %v657_v44 }
 0x18a   :  { %v859_v52 = vmul.f32 %v845_v46, %v833_v50  ;;  %1449 = vmatmul.mubr.msk.f32.vlgmr.msra.gmra.mrb[2].mxu0 %vm303_vm8, %v1446_v48  ;;  %1452 = vmatmul.mubr.msk.f32.vlgmr.msra.gmra.mrb[2].mxu1 %vm303_vm8, %v1446_v48 }
 0x18b   :  { %v829_v54 = vpop.permute.xlu0 %828  ;;  %943 = vmatprep.mubr.f32.mxu0 %v1581_v0  ;;  %1014 = vmatprep.mubr.f32.mxu1 %v1581_v0 }
 0x18c   :  { %v827_v55 = vpop.permute.xlu1 %826  ;;  %1455 = vmatprep.subr.msk.mxu0 %vm307_vm6, %v859_v52  ;;  %v834_v38 = vsel %vm830_vm10, %v829_v54, %v823_v49 }
 0x18d   :  { %v832_v56 = vsel %vm830_vm10, %v825_v47, %v827_v55  ;;  %v831_v57 = vsel %vm830_vm10, %v827_v55, %v829_v54  ;;  %v858_v41 = vmul.f32 %v841_v51, %v834_v38 }
 0x18e   :  { %v860_v58 = vmul.f32 %v849_v40, %v832_v56  ;;  %v861_v39 = vmul.f32 %v853_v53, %v831_v57 }
 0x18f   :  { %1456 = vmatpush1.msk.msra.mxu0 %vm307_vm6, %v858_v41 }
 0x190   :  { %1458 = vmatprep.subr.msk.mxu1 %vm307_vm6, %v861_v39  ;;  %1462 = vmatprep.subr.msk.mxu0 %vm307_vm6, %v1684_v32  ;;  %v1461_v32 = vld [vmem:[%s1859_s3 + $0x10] sm:$0xf] }
 0x191   :  { %1459 = vmatpush1.msk.msra.mxu1 %vm307_vm6, %v860_v58 }
 0x192   :  { %1457 = vmatmul.mubr.msk.f32.vlgmr.msra.gmra.mrb[2].mxu0 %vm303_vm8, %v1454_v59  ;;  %1460 = vmatmul.mubr.msk.f32.vlgmr.msra.gmra.mrb[2].mxu1 %vm303_vm8, %v1454_v59 }
 0x193   :  { %1463 = vmatpush1.msk.msra.mxu0 %vm307_vm6, %v1676_v27  ;;  %1465 = vmatprep.subr.msk.mxu1 %vm307_vm6, %v1682_v31 }
 0x194   :  { %1466 = vmatpush1.msk.msra.mxu1 %vm307_vm6, %v1678_v28  ;;  %1106 = vmatprep.mubr.f32.mxu0 %v1581_v0 }
 0x195   :  { %1177 = vmatprep.mubr.f32.mxu1 %v1581_v0 }
 0x19a   :  { %1464 = vmatmul.mubr.msk.f32.vlgmr.msra.gmra.mrb[2].mxu0 %vm303_vm8, %v1461_v32  ;;  %1467 = vmatmul.mubr.msk.f32.vlgmr.msra.gmra.mrb[2].mxu1 %vm303_vm8, %v1461_v32 }
 0x19b   :  { %1304 = vmatprep.mubr.f32.mxu0 %v1581_v0  ;;  %1375 = vmatprep.mubr.f32.mxu1 %v1581_v0 }
 0x19c   :  { %v1223_v22 = vpop.permute.xlu0 %1222 }
 0x19d   :  { %v1192_v27 = vpop.permute.xlu1 %1191 }
 0x26d   :  { %v1108_v31 = vpop.f32.mrb[2].mxu0  ;;  %v1179_v37 = vpop.f32.mrb[2].mxu1 }
 0x26e   :  { %v1194_v28 = vadd.f32 %v1192_v27, %v1108_v31  ;;  %v1196_v60 = vadd.f32 %v1192_v27, %v1179_v37  ;;  %v1110_v61 = vpop.f32.mrb[3].mxu0  ;;  %v1181_v62 = vpop.f32.mrb[3].mxu1 }
 0x26f   :  { %v1195_v63 = vadd.f32 %v1192_v27, %v1110_v61  ;;  %v1197_v1 = vadd.f32 %v1192_v27, %v1181_v62 }
 0x270   :  { %v1202_v6 = vmul.f32 1.442695, %v1194_v28  ;;  %v1206_v7 = vmul.f32 1.442695, %v1196_v60  ;;  %vm1198_vm12 = vcmp.gt.f32.partialorder %v1194_v28, 0.0  ;;  %vm1200_vm14 = vcmp.gt.f32.partialorder %v1196_v60, 0.0 }
 0x271   :  { %v1204_v8 = vmul.f32 1.442695, %v1195_v63  ;;  %v1208_v9 = vmul.f32 1.442695, %v1197_v1  ;;  %vm1199_vm11 = vcmp.gt.f32.partialorder %v1195_v63, 0.0  ;;  %vm1201_vm13 = vcmp.gt.f32.partialorder %v1197_v1, 0.0 }
 0x272   :  { %1516 = vpow2.f32 %v1202_v6 }
 0x273   :  { %1518 = vpow2.f32 %v1206_v7 }
 0x274   :  { %1520 = vpow2.f32 %v1204_v8 }
 0x275   :  { %1522 = vpow2.f32 %v1208_v9 }
 0x27c   :  { %v1517_v10 = vpop.eup %1516 }
 0x27d   :  { %v1519_v11 = vpop.eup %1518  ;;  %v1468_v12 = vadd.f32 -1.0, %v1517_v10 }
 0x27e   :  { %v1521_v0 = vpop.eup %1520  ;;  %v1470_v14 = vadd.f32 -1.0, %v1519_v11 }
 0x27f   :  { %v1523_v13 = vpop.eup %1522  ;;  %v1469_v15 = vadd.f32 -1.0, %v1521_v0  ;;  %v1214_v19 = vsel %vm1198_vm12, %v1194_v28, %v1468_v12 }
 0x280   :  { %v1471_v16 = vadd.f32 -1.0, %v1523_v13  ;;  %v1216_v21 = vsel %vm1200_vm14, %v1196_v60, %v1470_v14 }
 0x281   :  { %v1215_v17 = vsel %vm1199_vm11, %v1195_v63, %v1469_v15 }
 0x282   :  { %1472 = vmatprep.subr.msk.mxu0 %vm307_vm6, %v1215_v17  ;;  %v1217_v20 = vsel %vm1201_vm13, %v1197_v1, %v1471_v16 }
 0x283   :  { %1475 = vmatprep.subr.msk.mxu1 %vm307_vm6, %v1217_v20  ;;  %1473 = vmatpush1.msk.msra.mxu0 %vm307_vm6, %v1214_v19 }
 0x284   :  { %1476 = vmatpush1.msk.msra.mxu1 %vm307_vm6, %v1216_v21  ;;  %1474 = vmatmul.mubr.msk.f32.vlgmr.msra.gmra.mrb[4].mxu0 %vm303_vm8, %v1218_v18 }
 0x285   :  { %1477 = vmatmul.mubr.msk.f32.vlgmr.msra.gmra.mrb[4].mxu1 %vm303_vm8, %v1218_v18 }
 0x357   :  { %v1306_v23 = vpop.f32.mrb[4].mxu0 }
 0x358   :  { %v1307_v24 = vadd.f32 %v1306_v23, %v1223_v22  ;;  %v1377_v25 = vpop.f32.mrb[4].mxu1  ;;  %v1308_v26 = vpop.f32.mrb[5].mxu0 }
 0x359   :  { %v1378_v29 = vadd.f32 %v1377_v25, %v1223_v22  ;;  %v1309_v30 = vadd.f32 %v1308_v26, %v1223_v22  ;;  %v1379_v33 = vpop.f32.mrb[5].mxu1 }
 0x35a   :  { %v1382_v34 = vadd.f32 %v1307_v24, %v1660_v4  ;;  %v1380_v35 = vadd.f32 %v1379_v33, %v1223_v22 }
 0x35b   :  { %v1384_v36 = vadd.f32 %v1378_v29, %v1667_v5  ;;  %v1383_v42 = vadd.f32 %v1309_v30, %v1650_v2 }
 0x35c   :  { %v1390_v43 = vmul.f32 1.442695, %v1382_v34  ;;  %v1385_v44 = vadd.f32 %v1380_v35, %v1655_v3  ;;  %vm1386_vm15 = vcmp.gt.f32.partialorder %v1382_v34, 0.0 }
 0x35d   :  { %v1394_v45 = vmul.f32 1.442695, %v1384_v36  ;;  %v1392_v46 = vmul.f32 1.442695, %v1383_v42  ;;  %vm1388_vm0 = vcmp.gt.f32.partialorder %v1384_v36, 0.0  ;;  %vm1387_vm1 = vcmp.gt.f32.partialorder %v1383_v42, 0.0 }
 0x35e   :  { %1524 = vpow2.f32 %v1390_v43  ;;  %v1396_v47 = vmul.f32 1.442695, %v1385_v44  ;;  %vm1389_vm2 = vcmp.gt.f32.partialorder %v1385_v44, 0.0 }
 0x35f   :  { %1526 = vpow2.f32 %v1394_v45 }
 0x360   :  { %1528 = vpow2.f32 %v1392_v46 }
 0x361   :  { %1530 = vpow2.f32 %v1396_v47 }
 0x368   :  { %v1525_v48 = vpop.eup %1524 }
 0x369   :  { %v1527_v49 = vpop.eup %1526  ;;  %v1478_v50 = vadd.f32 -1.0, %v1525_v48 }
 0x36a   :  { %v1529_v51 = vpop.eup %1528  ;;  %v1480_v4 = vadd.f32 -1.0, %v1527_v49 }
 0x36b   :  { %v1531_v5 = vpop.eup %1530  ;;  %v1402_v2 = vsel %vm1386_vm15, %v1382_v34, %v1478_v50  ;;  %v1479_v52 = vadd.f32 -1.0, %v1529_v51 }
 0x36c   :  { %1406 = vst [vmem:[#allocation5] sm:$0xff] %v1402_v2  ;;  %v1404_v3 = vsel %vm1388_vm0, %v1384_v36, %v1480_v4  ;;  %v1481_v40 = vadd.f32 -1.0, %v1531_v5 }
 0x36d   :  { %1408 = vst [vmem:[#allocation5 + $0x10] sm:$0xff] %v1404_v3  ;;  %v1403_v53 = vsel %vm1387_vm1, %v1383_v42, %v1479_v52 }
 0x36e   :  { %1407 = vst [vmem:[#allocation5 + $0x8] sm:$0xff] %v1403_v53  ;;  %v1405_v54 = vsel %vm1389_vm2, %v1385_v44, %v1481_v40 }
 0x36f   :  { %1409 = vst [vmem:[#allocation5 + $0x18] sm:$0xff] %v1405_v54 }
 0x370   :  { %1565 = shalt.err (!%p1562_p12)
}
 0x371   :  { %s1566_s27 = scalar_lea.hbm %s1864_s8, 512 }
 0x372   :  { %p1567_p13 = scmp.ne.s32.totalorder %s1864_s8, %s1566_s27  ;;  %p1570_p0 = scmp.lt.u32.totalorder %s1566_s27, %s1864_s8 }
 0x374   :  { %p1572_p1 = pnand %p1570_p0, %p1567_p13 }
 0x376   :  { %1575 = shalt.err (!%p1572_p1)
}
 0x377   :  { %1419 = dma.vmem_to_hbm [thread:$0]  %s1417_s25, 512, %s1864_s8, [#allocation4]  }
 0x378   :  { %1578 = dma.done.wait [#allocation4], 512  }
 0x379   :  { %1579 = vsyncadd [#allocation4], 4294966784 }
 0x37a   :  { %1423 = vsyncpa [#allocation3], 1 }
 0x37b   :  { %1424 = vsyncpa [#allocation4], 1 }

</bundles_post_ra>
